<compile_context>
chip_gen: v5e
topology: v5e:2x2
jax: 0.10.0
libtpu: 0.0.40
codegen_flags: <defaults>
</compile_context>

<pallas_src>
import functools

import jax
import jax.numpy as jnp
from jax.experimental import pallas as pl
from jax.experimental.pallas import tpu as pltpu


def _direct_loss_kernel(y_q_ref, y_t_ref, y_c_ref, dp_ref, out_ref,
                        *, inv_mse_denom, inv_ce_denom):
    step = pl.program_id(0)

    # Tiny tensors: same block every grid step -> stay resident in VMEM.
    y_q = y_q_ref[...].astype(jnp.float32)          # (B, 2)
    y_t = y_t_ref[...].astype(jnp.float32)          # (B, 2)
    y_c0 = y_c_ref[0].astype(jnp.float32)           # (C, 2)  == y_c[0]

    # ---- direction targets from batch row 0 (strict '>' as in PyTorch) ----
    C = y_c0.shape[0]
    dy = y_t[0:1, :] - y_c0                         # (C, 2)
    pos0 = dy[:, 0:1] > 0.0                         # (C, 1)
    pos1 = dy[:, 1:2] > 0.0                         # (C, 1)
    # class per candidate: (+,+)->0, (+,-)->2, (-,+)->1, (-,-)->3
    cls = jnp.where(pos0,
                    jnp.where(pos1, 0, 2),
                    jnp.where(pos1, 1, 3)).astype(jnp.int32)      # (C, 1)
    k_iota = jax.lax.broadcasted_iota(jnp.int32, (C, 4), 1)       # (C, 4)
    tgt = (k_iota == cls).astype(jnp.float32)                     # (C, 4) one-hot
    n_k = jnp.sum(tgt, axis=0, keepdims=True)                     # (1, 4)

    # ---- init accumulator with the MSE term on the first step only ----
    @pl.when(step == 0)
    def _():
        diff = y_q - y_t
        out_ref[...] = jnp.sum(diff * diff, keepdims=True) * inv_mse_denom  # (1,1)

    # ---- cross-entropy partial for this B0 tile (class axis = 1, size C) ----
    dp = dp_ref[...].astype(jnp.float32)                          # (tb0, C, 4)
    m = jnp.max(dp, axis=1, keepdims=True)                        # (tb0, 1, 4)
    lse = jnp.log(jnp.sum(jnp.exp(dp - m), axis=1, keepdims=True)) + m  # (tb0,1,4)

    # -sum_c tgt[c,k] * logp[b,c,k] = n_k * lse[b,k] - sum_c tgt[c,k]*dp[b,c,k]
    term1 = jnp.sum(jnp.sum(lse * n_k[None], axis=0), keepdims=True)    # (1, 1)
    dp_bsum = jnp.sum(dp, axis=0)                                       # (C, 4)
    term2 = jnp.sum(tgt * dp_bsum, keepdims=True)                       # (1, 1)

    out_ref[...] += (term1 - term2) * inv_ce_denom


def _pick_b0_tile(b0, c, itemsize, budget_bytes=8 * 1024 * 1024):
    """Largest divisor of b0 whose (tb0, C, 4) block stays under the budget."""
    per_row = max(1, 4 * c * itemsize)
    cap = max(1, budget_bytes // per_row)
    best = 1
    for d in range(1, min(b0, cap) + 1):
        if b0 % d == 0:
            best = d
    return best


def direct_loss(y_q, y_target, y_c, direction_probs):
    """Pallas implementation of DirectLoss.forward (returns a scalar)."""
    B, D = y_q.shape
    Bc, C, two = y_c.shape
    B0, C2, K = direction_probs.shape
    assert C2 == C and K == 4 and D == 2 and two == 2

    tb0 = _pick_b0_tile(B0, C, jnp.dtype(direction_probs.dtype).itemsize)
    nsteps = B0 // tb0

    kernel = functools.partial(
        _direct_loss_kernel,
        inv_mse_denom=1.0 / float(B * D),
        inv_ce_denom=1.0 / float(B0 * K),
    )

    out = pl.pallas_call(
        kernel,
        out_shape=jax.ShapeDtypeStruct((1, 1), jnp.float32),
        grid_spec=pltpu.PrefetchScalarGridSpec(
            num_scalar_prefetch=0,
            grid=(nsteps,),
            in_specs=[
                pl.BlockSpec((B, D), lambda i: (0, 0)),            # y_q
                pl.BlockSpec((B, D), lambda i: (0, 0)),            # y_target
                pl.BlockSpec((Bc, C, 2), lambda i: (0, 0, 0)),     # y_c (full)
                pl.BlockSpec((tb0, C, 4), lambda i: (i, 0, 0)),    # direction_probs tile
            ],
            out_specs=pl.BlockSpec((1, 1), lambda i: (0, 0)),
        ),
        compiler_params=pltpu.CompilerParams(
            dimension_semantics=("arbitrary",),   # reduction into a scalar accumulator
            vmem_limit_bytes=32 * 1024 * 1024,
        ),
    )(y_q, y_target, y_c, direction_probs)
    return out[0, 0]


def direct_loss_ref(y_q, y_target, y_c, direction_probs):
    """Pure-JAX reference matching the PyTorch module."""
    dy0 = y_target[0, 0] - y_c[0, :, 0]
    dy1 = y_target[0, 1] - y_c[0, :, 1]
    cls = jnp.where(dy0 > 0, jnp.where(dy1 > 0, 0, 2), jnp.where(dy1 > 0, 1, 3))
    tgt = jax.nn.one_hot(cls, 4, dtype=jnp.float32)                   # (C, 4)
    tgt_b = jnp.broadcast_to(tgt[None], direction_probs.shape)        # (B0, C, 4)
    mse = jnp.mean((y_q - y_target) ** 2)
    logp = jax.nn.log_softmax(direction_probs, axis=1)                # class dim = 1
    ce = jnp.mean(-jnp.sum(tgt_b * logp, axis=1))
    return mse + ce


if __name__ == "__main__":
    key = jax.random.PRNGKey(0)
    k1, k2, k3, k4 = jax.random.split(key, 4)

    B, C, B0 = 2, 4, 2
    y_q = jax.random.normal(k1, (B, 2), jnp.float32)
    y_target = jax.random.normal(k2, (B, 2), jnp.float32)
    y_c = jax.random.normal(k3, (B, C, 2), jnp.float32)
    direction_probs = jax.random.normal(k4, (B0, C, 4), jnp.float32)

    loss = direct_loss(y_q, y_target, y_c, direction_probs)
    jax.block_until_ready(loss)

    ref = direct_loss_ref(y_q, y_target, y_c, direction_probs)
    assert jnp.allclose(loss, ref, rtol=1e-5, atol=1e-5), (loss, ref)

    print("KERNEL_OK")
</pallas_src>

<mosaic_0001>
module attributes {stable_mosaic.version = 11 : i64} {
  func.func @_direct_loss_kernel(%arg0: i32, %arg1: memref<2x2xf32, #tpu.memory_space<vmem>>, %arg2: memref<2x2xf32, #tpu.memory_space<vmem>>, %arg3: memref<2x4x2xf32, #tpu.memory_space<vmem>>, %arg4: memref<2x4x4xf32, #tpu.memory_space<vmem>>, %arg5: memref<1x1xf32, #tpu.memory_space<vmem>>) attributes {dimension_semantics = [#tpu.dimension_semantics<arbitrary>], iteration_bounds = array<i64: 1>, scalar_prefetch = 0 : i64, scratch_operands = 0 : i64, tpu.core_type = #tpu.core_type<tc>, window_params = [{pipeline_mode = #tpu.pipeline_mode<synchronous>, transform_indices = @transform_0, window_bounds = array<i64: 2, 2>}, {pipeline_mode = #tpu.pipeline_mode<synchronous>, transform_indices = @transform_1, window_bounds = array<i64: 2, 2>}, {pipeline_mode = #tpu.pipeline_mode<synchronous>, transform_indices = @transform_2, window_bounds = array<i64: 2, 4, 2>}, {transform_indices = @transform_3, window_bounds = array<i64: 2, 4, 4>}, {pipeline_mode = #tpu.pipeline_mode<synchronous>, transform_indices = @transform_4, window_bounds = array<i64: 1, 1>}]} {
    %c0 = arith.constant 0 : index
    %c0_0 = arith.constant 0 : index
    %0 = vector.load %arg1[%c0, %c0_0] : memref<2x2xf32, #tpu.memory_space<vmem>>, vector<2x2xf32>
    %c0_1 = arith.constant 0 : index
    %c0_2 = arith.constant 0 : index
    %1 = vector.load %arg2[%c0_1, %c0_2] : memref<2x2xf32, #tpu.memory_space<vmem>>, vector<2x2xf32>
    %c0_3 = arith.constant 0 : index
    %c0_4 = arith.constant 0 : index
    %c0_5 = arith.constant 0 : index
    %2 = vector.load %arg3[%c0_3, %c0_4, %c0_5] : memref<2x4x2xf32, #tpu.memory_space<vmem>>, vector<1x4x2xf32>
    %3 = vector.shape_cast %2 : vector<1x4x2xf32> to vector<4x2xf32>
    %4 = vector.extract_strided_slice %1 {offsets = [0, 0], sizes = [1, 2], strides = [1, 1]} : vector<2x2xf32> to vector<1x2xf32>
    %5 = vector.broadcast %4 : vector<1x2xf32> to vector<4x2xf32>
    %6 = arith.subf %5, %3 : vector<4x2xf32>
    %7 = vector.extract_strided_slice %6 {offsets = [0, 0], sizes = [4, 1], strides = [1, 1]} : vector<4x2xf32> to vector<4x1xf32>
    %cst = arith.constant 0.000000e+00 : f32
    %8 = vector.broadcast %cst : f32 to vector<4x1xf32>
    %9 = arith.cmpf ogt, %7, %8 : vector<4x1xf32>
    %10 = vector.extract_strided_slice %6 {offsets = [0, 1], sizes = [4, 1], strides = [1, 1]} : vector<4x2xf32> to vector<4x1xf32>
    %cst_6 = arith.constant 0.000000e+00 : f32
    %11 = vector.broadcast %cst_6 : f32 to vector<4x1xf32>
    %12 = arith.cmpf ogt, %10, %11 : vector<4x1xf32>
    %c0_i32 = arith.constant 0 : i32
    %c2_i32 = arith.constant 2 : i32
    %13 = vector.broadcast %c0_i32 : i32 to vector<4x1xi32>
    %14 = vector.broadcast %c2_i32 : i32 to vector<4x1xi32>
    %15 = arith.select %12, %13, %14 : vector<4x1xi1>, vector<4x1xi32>
    %c1_i32 = arith.constant 1 : i32
    %c3_i32 = arith.constant 3 : i32
    %16 = vector.broadcast %c1_i32 : i32 to vector<4x1xi32>
    %17 = vector.broadcast %c3_i32 : i32 to vector<4x1xi32>
    %18 = arith.select %12, %16, %17 : vector<4x1xi1>, vector<4x1xi32>
    %19 = arith.select %9, %15, %18 : vector<4x1xi1>, vector<4x1xi32>
    %20 = tpu.iota {dimensions = array<i32: 1>} : vector<4x4xi32>
    %21 = vector.broadcast %19 : vector<4x1xi32> to vector<4x4xi32>
    %22 = arith.cmpi eq, %20, %21 : vector<4x4xi32>
    %23 = arith.extui %22 : vector<4x4xi1> to vector<4x4xi32>
    %24 = arith.sitofp %23 : vector<4x4xi32> to vector<4x4xf32>
    %cst_7 = arith.constant dense<0.000000e+00> : vector<4xf32>
    %25 = vector.multi_reduction <add>, %24, %cst_7 [0] : vector<4x4xf32> to vector<4xf32>
    %26 = vector.shape_cast %25 : vector<4xf32> to vector<1x4xf32>
    %c0_i32_8 = arith.constant 0 : i32
    %27 = arith.cmpi eq, %arg0, %c0_i32_8 : i32
    %28 = arith.extui %27 : i1 to i32
    %c0_i32_9 = arith.constant 0 : i32
    %29 = arith.cmpi ne, %28, %c0_i32_9 : i32
    scf.if %29 {
      %62 = arith.subf %0, %1 : vector<2x2xf32>
      %63 = arith.mulf %62, %62 : vector<2x2xf32>
      %64 = vector.shape_cast %63 : vector<2x2xf32> to vector<1x2x2xf32>
      %cst_24 = arith.constant dense<0.000000e+00> : vector<1xf32>
      %65 = vector.multi_reduction <add>, %64, %cst_24 [1, 2] : vector<1x2x2xf32> to vector<1xf32>
      %66 = vector.shape_cast %65 : vector<1xf32> to vector<1x1x1xf32>
      %67 = vector.extract %66[0, 0, 0] : f32 from vector<1x1x1xf32>
      %68 = vector.broadcast %67 : f32 to vector<1x1xf32>
      %cst_25 = arith.constant 2.500000e-01 : f32
      %69 = vector.broadcast %cst_25 : f32 to vector<1x1xf32>
      %70 = arith.mulf %68, %69 : vector<1x1xf32>
      %c0_26 = arith.constant 0 : index
      %c0_27 = arith.constant 0 : index
      %71 = vector.load %arg5[%c0_26, %c0_27] : memref<1x1xf32, #tpu.memory_space<vmem>>, vector<1x1xf32>
      tpu.vector_store %arg5[%c0_26, %c0_27], %70 {strides = array<i32>} : memref<1x1xf32, #tpu.memory_space<vmem>>, vector<1x1xf32>,
    } else {
    }
    %c0_10 = arith.constant 0 : index
    %c0_11 = arith.constant 0 : index
    %c0_12 = arith.constant 0 : index
    %30 = vector.load %arg4[%c0_10, %c0_11, %c0_12] : memref<2x4x4xf32, #tpu.memory_space<vmem>>, vector<2x4x4xf32>
    %cst_13 = arith.constant dense<0xFF800000> : vector<2x4xf32>
    %31 = vector.multi_reduction <maximumf>, %30, %cst_13 [1] : vector<2x4x4xf32> to vector<2x4xf32>
    %32 = vector.shape_cast %31 : vector<2x4xf32> to vector<2x1x4xf32>
    %33 = vector.broadcast %32 : vector<2x1x4xf32> to vector<2x4x4xf32>
    %34 = arith.subf %30, %33 : vector<2x4x4xf32>
    %35 = math.exp %34 : vector<2x4x4xf32>
    %cst_14 = arith.constant dense<0.000000e+00> : vector<2x4xf32>
    %36 = vector.multi_reduction <add>, %35, %cst_14 [1] : vector<2x4x4xf32> to vector<2x4xf32>
    %37 = vector.shape_cast %36 : vector<2x4xf32> to vector<2x1x4xf32>
    %38 = math.log %37 : vector<2x1x4xf32>
    %39 = arith.addf %38, %32 : vector<2x1x4xf32>
    %40 = vector.shape_cast %26 : vector<1x4xf32> to vector<1x1x4xf32>
    %41 = vector.broadcast %40 : vector<1x1x4xf32> to vector<2x1x4xf32>
    %42 = arith.mulf %39, %41 : vector<2x1x4xf32>
    %cst_15 = arith.constant dense<0.000000e+00> : vector<1x4xf32>
    %43 = vector.multi_reduction <add>, %42, %cst_15 [0] : vector<2x1x4xf32> to vector<1x4xf32>
    %44 = vector.shape_cast %43 : vector<1x4xf32> to vector<1x1x4xf32>
    %cst_16 = arith.constant dense<0.000000e+00> : vector<1xf32>
    %45 = vector.multi_reduction <add>, %44, %cst_16 [1, 2] : vector<1x1x4xf32> to vector<1xf32>
    %46 = vector.shape_cast %45 : vector<1xf32> to vector<1x1x1xf32>
    %47 = vector.extract %46[0, 0, 0] : f32 from vector<1x1x1xf32>
    %48 = vector.broadcast %47 : f32 to vector<1x1xf32>
    %cst_17 = arith.constant dense<0.000000e+00> : vector<4x4xf32>
    %49 = vector.multi_reduction <add>, %30, %cst_17 [0] : vector<2x4x4xf32> to vector<4x4xf32>
    %50 = arith.mulf %24, %49 : vector<4x4xf32>
    %51 = vector.shape_cast %50 : vector<4x4xf32> to vector<1x4x4xf32>
    %cst_18 = arith.constant dense<0.000000e+00> : vector<1xf32>
    %52 = vector.multi_reduction <add>, %51, %cst_18 [1, 2] : vector<1x4x4xf32> to vector<1xf32>
    %53 = vector.shape_cast %52 : vector<1xf32> to vector<1x1x1xf32>
    %54 = vector.extract %53[0, 0, 0] : f32 from vector<1x1x1xf32>
    %55 = vector.broadcast %54 : f32 to vector<1x1xf32>
    %c0_19 = arith.constant 0 : index
    %c0_20 = arith.constant 0 : index
    %56 = vector.load %arg5[%c0_19, %c0_20] : memref<1x1xf32, #tpu.memory_space<vmem>>, vector<1x1xf32>
    %57 = arith.subf %48, %55 : vector<1x1xf32>
    %cst_21 = arith.constant 1.250000e-01 : f32
    %58 = vector.broadcast %cst_21 : f32 to vector<1x1xf32>
    %59 = arith.mulf %57, %58 : vector<1x1xf32>
    %60 = arith.addf %56, %59 : vector<1x1xf32>
    %c0_22 = arith.constant 0 : index
    %c0_23 = arith.constant 0 : index
    %61 = vector.load %arg5[%c0_22, %c0_23] : memref<1x1xf32, #tpu.memory_space<vmem>>, vector<1x1xf32>
    tpu.vector_store %arg5[%c0_22, %c0_23], %60 {strides = array<i32>} : memref<1x1xf32, #tpu.memory_space<vmem>>, vector<1x1xf32>,
    return
  }
  func.func @transform_0(%arg0: i32) -> (i32, i32) {
    %c0_i32 = arith.constant 0 : i32
    %c0_i32_0 = arith.constant 0 : i32
    %c0_i32_1 = arith.constant 0 : i32
    return %c0_i32, %c0_i32_0 : i32, i32
  }
  func.func @transform_1(%arg0: i32) -> (i32, i32) {
    %c0_i32 = arith.constant 0 : i32
    %c0_i32_0 = arith.constant 0 : i32
    %c0_i32_1 = arith.constant 0 : i32
    return %c0_i32, %c0_i32_0 : i32, i32
  }
  func.func @transform_2(%arg0: i32) -> (i32, i32, i32) {
    %c0_i32 = arith.constant 0 : i32
    %c0_i32_0 = arith.constant 0 : i32
    %c0_i32_1 = arith.constant 0 : i32
    %c0_i32_2 = arith.constant 0 : i32
    return %c0_i32, %c0_i32_0, %c0_i32_1 : i32, i32, i32
  }
  func.func @transform_3(%arg0: i32) -> (i32, i32, i32) {
    %c0_i32 = arith.constant 0 : i32
    %c0_i32_0 = arith.constant 0 : i32
    %c0_i32_1 = arith.constant 0 : i32
    return %arg0, %c0_i32, %c0_i32_0 : i32, i32, i32
  }
  func.func @transform_4(%arg0: i32) -> (i32, i32) {
    %c0_i32 = arith.constant 0 : i32
    %c0_i32_0 = arith.constant 0 : i32
    %c0_i32_1 = arith.constant 0 : i32
    return %c0_i32, %c0_i32_0 : i32, i32
  }
}

</mosaic_0001>

<bundles_post_ra>
// kernel: tpu_custom_call.1
= control target key start
LH: loop header
LB: loop body
LE: loop exit
PB: predicated region body
PF: predicated region fallthrough
CT: control target
= control target key end

     0   :  { %s283_s0 = inlined_call_operand.vmem [shape: f32[2,2], index: 0, kind: input, shape index: {}]   ;;  %s284_s1 = inlined_call_operand.vmem [shape: f32[2,2], index: 1, kind: input, shape index: {}]   ;;  %s285_s2 = inlined_call_operand.vmem [shape: f32[2,4,2], index: 2, kind: input, shape index: {}]   ;;  %s286_s3 = inlined_call_operand.vmem [shape: f32[2,4,4], index: 3, kind: input, shape index: {}]   ;;  %s287_s4 = inlined_call_operand.hbm [shape: f32[1,1], index: 4, kind: output, shape index: {}]  }
   0x1   :  { %v19_v0 = vld [vmem:[%s284_s1] sm:$0x3] }
   0x2   :  { %v20_v1 = vld [vmem:[%s285_s2] sm:$0xf]  ;;  %v21_v2 = vperm.slane %v19_v0, 0 }
   0x3   :  { %9 = vsyncpa [#allocation3], 0  ;;  %v214_v4 = vmov 2   ;;  %s215_s19 = smov 127   ;;  %v216_v6 = vmov 3   ;;  %v217_v8 = vmov 0   ;;  %v31_v50 = vlaneseq }
   0x4   :  { %v22_v3 = vsub.f32 %v21_v2, %v20_v1  ;;  %178 = vset.pattern.permute.xlu1 %v217_v8  ;;  %179 = vset.pattern.permute.xlu0 %v217_v8  ;;  %vm39_vm1 = vcmask 27648   ;;  %v254_v12 = vld [vmem:[%s286_s3] sm:$0xf]  ;;  %v259_v13 = vld [vmem:[%s286_s3 + $0x4] sm:$0xf]  ;;  %vm53_vm2 = vcmask 9216  }
   0x5   :  { %v70_v14 = vsel %vm39_vm1, %v254_v12, -inf  ;;  %v77_v15 = vsel %vm39_vm1, %v259_v13, -inf  ;;  %v18_v40 = vld [vmem:[%s283_s0] sm:$0x3]  ;;  %v32_v53 = vand.u32 127, %v31_v50  ;;  %v218_v55 = vmov 0.0  }
   0x6   :  { %vm23_vm0 = vcmp.gt.f32.partialorder %v22_v3, 0.0  ;;  %v71_v16 = vrot.slane %v70_v14, 4  ;;  %v78_v17 = vrot.slane %v77_v15, 4  ;;  %v51_v41 = vsub.f32 %v18_v40, %v19_v0  ;;  %s219_s25 = smov [#allocation2]   ;;  %s156_s29 = sshll.u32 %s287_s4, 4  ;;  %s157_s29 = int_to_ptr.hbm [resolvable:$true] %s156_s29 }
   0x7   :  { %v24_v5 = vsel %vm23_vm0, 0, %v214_v4  ;;  %v25_v7 = vsel %vm23_vm0, 1, %v216_v6  ;;  %vm112_vm4 = vcmask 31744   ;;  %v128_v8 = vsel %vm39_vm1, %v254_v12, 0.0  ;;  %s154_s26 = sshll.u32 %s219_s25, 4  ;;  %s155_s26 = int_to_ptr.vmem [resolvable:$true] %s154_s26 }
   0x8   :  { %26 = vrot.lane.b32.xlu0 %v24_v5, %s215_s19  ;;  %v72_v18 = vmax.f32 %v70_v14, %v71_v16  ;;  %v79_v19 = vmax.f32 %v77_v15, %v78_v17  ;;  %v52_v43 = vmul.f32 %v51_v41, %v51_v41  ;;  %vm116_vm5 = vcmask 24576  }
   0x9   :  { %vm66_vm6 = vcmask 0  }
   0xa   :  { %v73_v20 = vrot.slane %v72_v18, 2  ;;  %v80_v21 = vrot.slane %v79_v19, 2  ;;  %v54_v45 = vsel %vm53_vm2, %v52_v43, 0.0 }
   0xc   :  { %v74_v22 = vmax.f32 %v72_v18, %v73_v20  ;;  %v81_v23 = vmax.f32 %v79_v19, %v80_v21 }
   0xe   :  { %v75_v24 = vrot.slane %v74_v22, 1  ;;  %v82_v25 = vrot.slane %v81_v23, 1 }
  0x10   :  { %28 = vrot.lane.b32.xlu0 %v25_v7, %s215_s19  ;;  %v76_v26 = vmax.f32 %v74_v22, %v75_v24  ;;  %v83_v27 = vmax.f32 %v81_v23, %v82_v25 }
  0x12   :  { %v84_v28 = vsub.f32 %v254_v12, %v76_v26  ;;  %v85_v29 = vsub.f32 %v259_v13, %v83_v27 }
  0x14   :  { %v86_v30 = vmul.f32 1.442695, %v84_v28  ;;  %v88_v31 = vmul.f32 1.442695, %v85_v29 }
  0x16   :  { %180 = vpow2.f32 %v86_v30 }
  0x17   :  { %182 = vpow2.f32 %v88_v31 }
  0x1c   :  { %v181_v32 = vpop.eup %180 }
  0x1d   :  { %v183_v33 = vpop.eup %182  ;;  %v90_v34 = vsel %vm39_vm1, %v181_v32, 0.0 }
  0x1e   :  { %v97_v35 = vsel %vm39_vm1, %v183_v33, 0.0  ;;  %v91_v36 = vrot.slane %v90_v34, 4 }
  0x1f   :  { %v98_v37 = vrot.slane %v97_v35, 4 }
  0x20   :  { %v92_v38 = vadd.f32 %v91_v36, %v90_v34 }
  0x21   :  { %v99_v39 = vadd.f32 %v98_v37, %v97_v35 }
  0x22   :  { %v93_v42 = vrot.slane %v92_v38, 2 }
  0x23   :  { %v100_v44 = vrot.slane %v99_v39, 2 }
  0x24   :  { %v94_v46 = vadd.f32 %v93_v42, %v92_v38 }
  0x25   :  { %v101_v47 = vadd.f32 %v100_v44, %v99_v39 }
  0x26   :  { %v95_v48 = vrot.slane %v94_v46, 1 }
  0x27   :  { %v102_v49 = vrot.slane %v101_v47, 1 }
  0x28   :  { %v96_v51 = vadd.f32 %v95_v48, %v94_v46 }
  0x29   :  { %v103_v52 = vadd.f32 %v102_v49, %v101_v47 }
  0x2a   :  { %184 = vlog2.f32 %v96_v51 }
  0x2b   :  { %186 = vlog2.f32 %v103_v52 }
  0x30   :  { %v185_v58 = vpop.eup %184 }
  0x31   :  { %v187_v60 = vpop.eup %186  ;;  %v105_v63 = vmul.f32 0.6931472, %v185_v58 }
  0x32   :  { %v107_v0 = vmul.f32 0.6931472, %v187_v60 }
  0x33   :  { %v108_v3 = vadd.f32 %v105_v63, %v76_v26 }
  0x34   :  { %v109_v4 = vadd.f32 %v107_v0, %v83_v27 }
  0x7a   :  { %v27_v9 = vpop.permute.xlu0 %26 }
  0x82   :  { %v29_v10 = vpop.permute.xlu0 %28 }
  0x83   :  { %v30_v11 = vsel %vm23_vm0, %v27_v9, %v29_v10 }
  0x84   :  { %34 = vperm.xlu1 %178, %v30_v11   ;;  %v129_v11 = vsel %vm39_vm1, %v259_v13, 0.0 }
  0x85   :  { %v130_v16 = vadd.f32 %v129_v11, %v128_v8 }
  0xae   :  { %55 = vadd.xlane.f32.xlu1 %v54_v45 }
  0xf6   :  { %v35_v54 = vpop.permute.xlu1 %34 }
  0xf7   :  { %vm36_vm3 = vcmp.eq.s32.totalorder %v32_v53, %v35_v54 }
  0xf8   :  { %v165_v56 = vsel %vm36_vm3, 1.0, %v218_v55 }
  0xf9   :  { %v40_v57 = vsel %vm39_vm1, %v165_v56, 0.0  ;;  %v131_v17 = vmul.f32 %v165_v56, %v130_v16 }
  0xfa   :  { %v41_v59 = vrot.slane %v40_v57, 4 }
  0xfb   :  { %v132_v18 = vsel %vm39_vm1, %v131_v17, 0.0 }
  0xfc   :  { %v42_v61 = vadd.f32 %v41_v59, %v40_v57 }
  0xfe   :  { %v43_v62 = vrot.slane %v42_v61, 2 }
 0x100   :  { %v44_v1 = vadd.f32 %v43_v62, %v42_v61 }
 0x102   :  { %v45_v2 = vrot.slane %v44_v1, 1 }
 0x104   :  { %v46_v5 = vadd.f32 %v45_v2, %v44_v1 }
 0x106   :  { %v110_v6 = vmul.f32 %v108_v3, %v46_v5  ;;  %v111_v7 = vmul.f32 %v109_v4, %v46_v5 }
 0x108   :  { %v113_v9 = vsel %vm112_vm4, %v110_v6, 0.0  ;;  %v114_v10 = vsel %vm112_vm4, %v111_v7, 0.0 }
 0x109   :  { %v115_v14 = vadd.f32 %v114_v10, %v113_v9 }
 0x10b   :  { %v117_v15 = vsel %vm116_vm5, %v115_v14, 0.0 }
 0x10c   :  { %118 = vadd.xlane.f32.xlu2 %v117_v15 }
 0x114   :  { %133 = vadd.xlane.f32.xlu2 %v132_v18 }
 0x121   :  { %v56_v19 = vpop.xlane.xlu1 %55 }
 0x122   :  { %v57_v20 = vrot.slane %v56_v19, 4 }
 0x124   :  { %v58_v21 = vadd.f32 %v57_v20, %v56_v19 }
 0x126   :  { %v59_v22 = vrot.slane %v58_v21, 2 }
 0x128   :  { %v60_v23 = vadd.f32 %v59_v22, %v58_v21 }
 0x12a   :  { %v61_v12 = vrot.slane %v60_v23, 1 }
 0x12c   :  { %v62_v24 = vadd.f32 %v61_v12, %v60_v23 }
 0x12e   :  { %166 = vpush %v62_v24 }
 0x15f   :  { %s167_s0 = spop %166 }
 0x160   :  { %v64_v38 = vstv %s167_s0 }
 0x161   :  { %v65_v39 = vmul.f32 0.25, %v64_v38 }
 0x163   :  { %67 = vst.msk [vmem:[#allocation2] sm:$0x1] %vm66_vm6, %v65_v39 }
 0x16a   :  { %v143_v44 = vld [vmem:[#allocation2] sm:$0x1] }
 0x17f   :  { %v119_v25 = vpop.xlane.xlu2 %118 }
 0x180   :  { %v120_v26 = vrot.slane %v119_v25, 4 }
 0x182   :  { %v121_v27 = vadd.f32 %v120_v26, %v119_v25 }
 0x184   :  { %v122_v13 = vrot.slane %v121_v27, 2 }
 0x186   :  { %v123_v28 = vadd.f32 %v122_v13, %v121_v27 }
 0x187   :  { %v134_v29 = vpop.xlane.xlu2 %133 }
 0x188   :  { %v135_v30 = vrot.slane %v134_v29, 4  ;;  %v124_v31 = vrot.slane %v123_v28, 1 }
 0x18a   :  { %v136_v32 = vadd.f32 %v135_v30, %v134_v29  ;;  %v125_v33 = vadd.f32 %v124_v31, %v123_v28 }
 0x18c   :  { %v137_v34 = vrot.slane %v136_v32, 2  ;;  %168 = vpush %v125_v33 }
 0x18e   :  { %v138_v35 = vadd.f32 %v137_v34, %v136_v32 }
 0x190   :  { %v139_v36 = vrot.slane %v138_v35, 1 }
 0x192   :  { %v140_v37 = vadd.f32 %v139_v36, %v138_v35 }
 0x194   :  { %170 = vpush %v140_v37 }
 0x1bd   :  { %s169_s23 = spop %168 }
 0x1be   :  { %v127_v40 = vstv %s169_s23 }
 0x1c5   :  { %s171_s24 = spop %170 }
 0x1c6   :  { %v142_v41 = vstv %s171_s24 }
 0x1c7   :  { %v144_v42 = vsub.f32 %v127_v40, %v142_v41 }
 0x1c9   :  { %v145_v43 = vmul.f32 0.125, %v144_v42 }
 0x1cb   :  { %v146_v45 = vadd.f32 %v145_v43, %v143_v44 }
 0x1cd   :  { %148 = vst.msk [vmem:[#allocation2] sm:$0x1] %vm66_vm6, %v146_v45 }
 0x1ce   :  { %159 = dma.vmem_to_hbm [thread:$0]  %s155_s26, 16, %s157_s29, [#allocation3]  }
 0x1cf   :  { %212 = dma.done.wait [#allocation3], 16  }
 0x1d0   :  { %213 = vsyncadd [#allocation3], 4294967280 }
 0x1d1   :  { %164 = vsyncpa [#allocation3], 1 }

</bundles_post_ra>
